<compile_context>
chip_gen: v7x
topology: tpu7x:2x2x1
jax: 0.10.0
libtpu: 0.0.40
codegen_flags: <defaults>
</compile_context>

<pallas_src>
import jax
import jax.numpy as jnp
from jax.experimental import pallas as pl
from jax.experimental.pallas import tpu as pltpu

_LANE = 128
_SUBLANE = 8


def _round_up(n: int, m: int) -> int:
    return ((n + m - 1) // m) * m


def _linreg_kernel(x_ref, w_ref, b_ref, o_ref):
    # x_ref: (TB, D) VMEM tile (streamed); w_ref: (D, 1) VMEM (resident);
    # b_ref: (1, 1) SMEM scalar; o_ref: (TB, 1) VMEM.
    acc = jnp.dot(x_ref[...], w_ref[...],
                  preferred_element_type=jnp.float32)        # MXU, f32 accumulate
    o_ref[...] = (acc + b_ref[0, 0]).astype(o_ref.dtype)


def linear_regression(x, w, b, *,
                      tile_bytes=4 * 1024 * 1024,
                      vmem_budget_bytes=32 * 1024 * 1024,
                      min_grid_steps=4):
    """y = x @ w.T + b  (forward of PyTorch nn.Linear(input_size, 1)).

    x: (B, D); w: (1, D) (PyTorch (out=1, in=D) layout) or (D,); b: scalar/(1,).
    Returns (B, 1) in x.dtype.
    """
    B, D = x.shape
    x_isz = jnp.dtype(x.dtype).itemsize
    o_isz = x_isz
    d_pad = _round_up(D, _LANE)

    # ---- choose the row tile TB -------------------------------------------
    # (1) big enough in streamed bytes to amortize ~0.35 us per-grid-step cost:
    tb_stream = max(_SUBLANE, tile_bytes // (D * x_isz))
    # (2) small enough that double-buffered, lane-padded buffers fit VMEM:
    per_row_vmem = 2 * d_pad * x_isz + 2 * _LANE * o_isz     # x tile + (TB,1) out
    w_vmem = 2 * _round_up(D, _SUBLANE) * _LANE * x_isz      # resident (D,1) weight
    tb_vmem = max(_SUBLANE, (vmem_budget_bytes - w_vmem) // per_row_vmem)
    # (3) small enough that the grid has several steps (megacore sharding):
    tb_split = max(_SUBLANE, pl.cdiv(B, min_grid_steps))

    TB = min(tb_stream, tb_vmem, tb_split)
    TB = (TB // _LANE) * _LANE if TB >= _LANE else (TB // _SUBLANE) * _SUBLANE
    TB = max(TB, _SUBLANE)
    if TB >= B:
        TB = B                      # single full-extent block (legal for any B)
    grid = (pl.cdiv(B, TB),)        # ragged last block handled with masked writes

    w_col = jnp.asarray(w, x.dtype).reshape(D, 1)        # (in, out=1) column for MXU
    b_smem = jnp.asarray(b, jnp.float32).reshape(1, 1)   # scalar bias -> SMEM

    vmem_limit = int(min(
        60 * 1024 * 1024,
        max(8 * 1024 * 1024,
            2 * TB * d_pad * x_isz          # double-buffered x tiles
            + 2 * TB * _LANE * o_isz        # double-buffered (TB,1) out (lane-padded)
            + w_vmem                        # resident weight column
            + (2 << 20)),                   # Mosaic internal scratch headroom
    ))

    out = pl.pallas_call(
        _linreg_kernel,
        out_shape=jax.ShapeDtypeStruct((B, 1), x.dtype),
        grid_spec=pltpu.PrefetchScalarGridSpec(
            num_scalar_prefetch=0,
            grid=grid,
            in_specs=[
                pl.BlockSpec((TB, D), lambda i: (i, 0)),              # streamed x
                pl.BlockSpec((D, 1), lambda i: (0, 0)),               # resident w
                pl.BlockSpec(memory_space=pltpu.MemorySpace.SMEM),    # bias scalar
            ],
            out_specs=pl.BlockSpec((TB, 1), lambda i: (i, 0)),
        ),
        compiler_params=pltpu.CompilerParams(
            dimension_semantics=("parallel",),
            vmem_limit_bytes=vmem_limit,
        ),
        cost_estimate=pl.CostEstimate(
            flops=2 * B * D,
            transcendentals=0,
            bytes_accessed=x_isz * (B * D + D) + o_isz * B,
        ),
    )(x, w_col, b_smem)

    return out


if __name__ == "__main__":
    input_size = 32
    batch = 8

    key = jax.random.PRNGKey(0)
    kx, kw, kb = jax.random.split(key, 3)

    # Deterministic init mirroring nn.Linear's U(-1/sqrt(D), 1/sqrt(D)).
    bound = 1.0 / jnp.sqrt(jnp.float32(input_size))
    w = jax.random.uniform(kw, (1, input_size), jnp.float32, -bound, bound)  # (out, in)
    b = jax.random.uniform(kb, (1,), jnp.float32, -bound, bound)

    x = jax.random.normal(kx, (batch, input_size), jnp.float32)

    out = jax.block_until_ready(linear_regression(x, w, b))

    # Reference check (plain JAX). Tolerance leaves margin for MXU multi-pass
    # f32 accumulation while still catching any semantic bug.
    ref = x @ w.T + b
    assert out.shape == (batch, 1)
    assert jnp.allclose(out, ref, atol=2e-3, rtol=2e-3)

    print("KERNEL_OK")
</pallas_src>

<mosaic_0001>
module attributes {stable_mosaic.version = 11 : i64} {
  func.func @_linreg_kernel(%arg0: i32, %arg1: memref<8x32xf32, #tpu.memory_space<vmem>>, %arg2: memref<32x1xf32, #tpu.memory_space<vmem>>, %arg3: memref<1x1xf32, #tpu.memory_space<smem>>, %arg4: memref<8x1xf32, #tpu.memory_space<vmem>>) attributes {dimension_semantics = [#tpu.dimension_semantics<parallel>], iteration_bounds = array<i64: 1>, scalar_prefetch = 0 : i64, scratch_operands = 0 : i64, tpu.core_type = #tpu.core_type<tc>, window_params = [{transform_indices = @transform_0, window_bounds = array<i64: 8, 32>}, {pipeline_mode = #tpu.pipeline_mode<synchronous>, transform_indices = @transform_1, window_bounds = array<i64: 32, 1>}, {transform_indices = @transform_2, window_bounds = array<i64: 1, 1>}, {transform_indices = @transform_3, window_bounds = array<i64: 8, 1>}]} {
    %c0 = arith.constant 0 : index
    %c0_0 = arith.constant 0 : index
    %0 = vector.load %arg1[%c0, %c0_0] : memref<8x32xf32, #tpu.memory_space<vmem>>, vector<8x32xf32>
    %c0_1 = arith.constant 0 : index
    %c0_2 = arith.constant 0 : index
    %1 = vector.load %arg2[%c0_1, %c0_2] : memref<32x1xf32, #tpu.memory_space<vmem>>, vector<32x1xf32>
    %cst = arith.constant dense<0.000000e+00> : vector<8x1xf32>
    %2 = tpu.matmul %0, %1, %cst {dimension_numbers = #tpu.dot_dimension_numbers<[1], [0], [0], [1], [0, 0, 1, 1], [], []>} : vector<8x32xf32>, vector<32x1xf32>, vector<8x1xf32> -> vector<8x1xf32>
    %c0_3 = arith.constant 0 : index
    %c0_4 = arith.constant 0 : index
    %3 = memref.load %arg3[%c0_3, %c0_4] : memref<1x1xf32, #tpu.memory_space<smem>>
    %4 = vector.broadcast %3 : f32 to vector<8x1xf32>
    %5 = arith.addf %2, %4 : vector<8x1xf32>
    %c0_5 = arith.constant 0 : index
    %c0_6 = arith.constant 0 : index
    %6 = vector.load %arg4[%c0_5, %c0_6] : memref<8x1xf32, #tpu.memory_space<vmem>>, vector<8x1xf32>
    tpu.vector_store %arg4[%c0_5, %c0_6], %5 {strides = array<i32>} : memref<8x1xf32, #tpu.memory_space<vmem>>, vector<8x1xf32>,
    return
  }
  func.func @transform_0(%arg0: i32) -> (i32, i32) {
    %c0_i32 = arith.constant 0 : i32
    %c0_i32_0 = arith.constant 0 : i32
    return %arg0, %c0_i32 : i32, i32
  }
  func.func @transform_1(%arg0: i32) -> (i32, i32) {
    %c0_i32 = arith.constant 0 : i32
    %c0_i32_0 = arith.constant 0 : i32
    %c0_i32_1 = arith.constant 0 : i32
    return %c0_i32, %c0_i32_0 : i32, i32
  }
  func.func @transform_2(%arg0: i32) -> (i32, i32) {
    %c0_i32 = arith.constant 0 : i32
    %c0_i32_0 = arith.constant 0 : i32
    %c0_i32_1 = arith.constant 0 : i32
    return %c0_i32, %c0_i32_0 : i32, i32
  }
  func.func @transform_3(%arg0: i32) -> (i32, i32) {
    %c0_i32 = arith.constant 0 : i32
    %c0_i32_0 = arith.constant 0 : i32
    return %arg0, %c0_i32 : i32, i32
  }
}

</mosaic_0001>

<bundles_post_ra>
// kernel: tpu_custom_call.1
= control target key start
LH: loop header
LB: loop body
LE: loop exit
PB: predicated region body
PF: predicated region fallthrough
CT: control target
= control target key end

     0   :  { %v128_v0 = vmov 0.0|0.0   ;;  %vm129_vm0 = vmmov 0   ;;  %v130_v4 = vmov 0.0   ;;  %vm22_vm1 = vcmask 261120   ;;  %s172_s1 = inlined_call_operand.vmem [shape: f32[32,1], index: 1, kind: input, shape index: {}]   ;;  %s173_s0 = inlined_call_operand.vmem [shape: f32[8,32], index: 0, kind: input, shape index: {}]   ;;  %s174_s2 = inlined_call_operand.<no memory space> [shape: f32[1,1], index: 2, kind: input, shape index: {}]   ;;  %s175_s3 = inlined_call_operand.vmem [shape: f32[8,1], index: 3, kind: output, shape index: {}]  }
   0x1   :  { %119 = vmatprep.subr.bf16.mxu0 %v128_v0  ;;  %v16_v1 = vld [vmem:[%s172_s1] sm:$0xff]  ;;  %v17_v2 = vld [vmem:[%s172_s1 + $0x8] sm:$0xff]  ;;  %v18_v3 = vld [vmem:[%s172_s1 + $0x10] sm:$0xff]  ;;  %116 = vmatprep.mubr.msk.f32.mxu0 %vm129_vm0, %v130_v4  ;;  %v21_v9 = vstv %s174_s2  ;;  %vm96_vm2 = vcmask 7168  }
   0x2   :  { %v120_v5 = vpack.c.bf16 %v17_v2, %v16_v1  ;;  %v19_v6 = vld [vmem:[%s172_s1 + $0x18] sm:$0xff]  ;;  %v15_v8 = vld [vmem:[%s173_s0] sm:$0xff] }
   0x3   :  { %v123_v7 = vpack.c.bf16 %v19_v6, %v18_v3 }
   0x4   :  { %121 = vmatpush3.bf16.msra.mxu0 %v120_v5 }
   0x5   :  { %122 = vmatprep.subr.bf16.mxu0 %v128_v0 }
   0x8   :  { %124 = vmatpush3.bf16.msra.mxu0 %v123_v7 }
   0xb   :  { %117 = vmatmul.mubr.msk.f32.vlgmr.msra.gmra.mrb[0].mxu0 %vm22_vm1, %v15_v8 }
  0xde   :  { %v92_v10 = vpop.f32.mrb[0].mxu0 }
  0xdf   :  { %v93_v11 = vadd.f32 %v92_v10, %v21_v9  ;;  %v118_v12 = vpop.f32.mrb[1].mxu0 }
  0xe1   :  { %97 = vst.msk [vmem:[%s175_s3] sm:$0xff] %vm96_vm2, %v93_v11 }

</bundles_post_ra>
